<compile_context>
chip_gen: v7x
topology: tpu7x:2x2x1
jax: 0.10.0
libtpu: 0.0.40
codegen_flags: <defaults>
</compile_context>

<pallas_src>
import functools
import math

import jax
import jax.numpy as jnp
from jax import lax
from jax.experimental import pallas as pl
from jax.experimental.pallas import tpu as pltpu

# --------------------------------------------------------------------------
# "configs" (small, deterministic)
# --------------------------------------------------------------------------
BATCH = 2
SEQ_LEN = 8          # L
D_MODEL = 32
D_FF = 64
D_STATE = 16
DT_RANK = 4
DT_SCALE = 1.0
DT_MIN = 1e-3
DT_MAX = 1e-1
DT_INIT_FLOOR = 1e-4
# configs.bias = False (no bias on in_proj / out_proj), configs.pscan = False.


# --------------------------------------------------------------------------
# Pallas kernel: full MambaBlock forward for one batch element
# --------------------------------------------------------------------------
def mamba_block_kernel(x_ref, w_in_x_ref, w_in_z_ref, w_delta_ref, b_dt_ref,
                       w_b_ref, w_c_ref, a_log_ref, w_out_ref, o_ref, y_s,
                       *, L, d_ff, d_state):
    xm = x_ref[0]                                                  # (L, d_model)

    # in_proj (bias=False): two lane-aligned matmuls, one per chunk half.
    xp = jnp.dot(xm, w_in_x_ref[...], preferred_element_type=jnp.float32)  # (L, d_ff)
    zp = jnp.dot(xm, w_in_z_ref[...], preferred_element_type=jnp.float32)  # (L, d_ff)
    xs = xp * jax.nn.sigmoid(xp)                                   # silu(x)

    # x_proj with dt_proj folded in; unused D columns were trimmed in the
    # wrapper.  Separate matmuls keep delta / B / C each starting at lane 0.
    delta = jax.nn.softplus(
        jnp.dot(xs, w_delta_ref[...], preferred_element_type=jnp.float32)
        + b_dt_ref[...])                                           # (L, d_ff)
    Bm = jnp.dot(xs, w_b_ref[...], preferred_element_type=jnp.float32)   # (L, d_state)
    Cm = jnp.dot(xs, w_c_ref[...], preferred_element_type=jnp.float32)   # (L, d_state)

    # One-time prep for the scan (hoisted out of the unrolled loop).
    a_col = -jnp.exp(a_log_ref[...]).T                             # (d_state, 1)
    dtx = delta * xs                                               # (L, d_ff)
    Bt = Bm.T                                                      # (d_state, L)
    Ct = Cm.T                                                      # (d_state, L)

    # Unrolled selective scan; h stays in vregs:
    #   h_t = exp(delta_t * A) * h_{t-1} + delta_t * B_t * x_t
    #   y_t = sum_s h_t[s, :] * C_t[s]
    h = jnp.zeros((d_state, d_ff), jnp.float32)
    for t in range(L):                                             # L is static
        d_row = delta[t:t + 1, :]                                  # (1, d_ff)
        dA_t = jnp.exp(a_col * d_row)                              # (d_state, d_ff)
        bx_t = Bt[:, t:t + 1] * dtx[t:t + 1, :]                    # (d_state, d_ff)
        h = dA_t * h + bx_t
        y_s[pl.ds(t, 1), :] = jnp.sum(h * Ct[:, t:t + 1],
                                      axis=0, keepdims=True)       # (1, d_ff)

    # Gate with silu(z) and apply out_proj (bias=False).
    y = y_s[...]                                                   # (L, d_ff)
    zs = zp * jax.nn.sigmoid(zp)
    out = jnp.dot(y * zs, w_out_ref[...], preferred_element_type=jnp.float32)
    o_ref[0] = out.astype(o_ref.dtype)


# --------------------------------------------------------------------------
# Wrapper
# --------------------------------------------------------------------------
def mamba_block(x, w_in_x, w_in_z, w_delta, b_dt, w_b, w_c, a_log, w_out_t):
    """x: (B, L, d_model).  Weights pre-transposed / fused to (in, out) layout."""
    B, L, d_model = x.shape
    d_ff = w_in_x.shape[1]
    d_state = w_b.shape[1]

    kernel = functools.partial(mamba_block_kernel, L=L, d_ff=d_ff,
                               d_state=d_state)

    weights = (w_in_x, w_in_z, w_delta, b_dt, w_b, w_c, a_log, w_out_t)

    def resident(arr):
        nd = arr.ndim
        return pl.BlockSpec(arr.shape, lambda b, _nd=nd: (0,) * _nd)

    return pl.pallas_call(
        kernel,
        out_shape=jax.ShapeDtypeStruct((B, L, d_model), x.dtype),
        grid_spec=pltpu.PrefetchScalarGridSpec(
            num_scalar_prefetch=0,
            grid=(B,),
            in_specs=[pl.BlockSpec((1, L, d_model), lambda b: (b, 0, 0))]
                     + [resident(w) for w in weights],
            out_specs=pl.BlockSpec((1, L, d_model), lambda b: (b, 0, 0)),
            scratch_shapes=[
                pltpu.VMEM((L, d_ff), jnp.float32),      # y (scan output rows)
            ],
        ),
        # v7x: batch axis maps onto the two TensorCores; on single-TC v5e/v6e
        # this is a cheap serial loop (B=2 -> one extra ~0.35us grid step).
        compiler_params=pltpu.CompilerParams(
            dimension_semantics=("parallel",)),
    )(x, *weights)


# --------------------------------------------------------------------------
# Weight preparation: transpose, trim unused D columns, fold dt_proj.
# --------------------------------------------------------------------------
def prepare_kernel_params(w_in, w_x, w_dt, b_dt, a_log, w_out):
    w_in_t = w_in.T                                   # (d_model, 2*d_ff)
    w_in_x = w_in_t[:, :D_FF]                         # x half of in_proj
    w_in_z = w_in_t[:, D_FF:]                         # z half of in_proj
    w_x_t = w_x.T                                     # (d_ff, dt_rank+2*d_state+d_ff)
    # Fold dt_proj into x_proj:  delta_pre = xs @ (W_x_delta @ W_dt^T) + b_dt.
    w_delta = w_x_t[:, :DT_RANK] @ w_dt.T             # (d_ff, d_ff)
    w_b = w_x_t[:, DT_RANK:DT_RANK + D_STATE]         # (d_ff, d_state)
    w_c = w_x_t[:, DT_RANK + D_STATE:DT_RANK + 2 * D_STATE]
    # D block of x_proj (last d_ff columns) is never used -> dropped entirely.
    return (w_in_x, w_in_z, w_delta, b_dt[None, :], w_b, w_c, a_log, w_out.T)


# --------------------------------------------------------------------------
# Pure-JAX reference (mirrors the PyTorch forward exactly, raw weights)
# --------------------------------------------------------------------------
def mamba_ref(x, w_in, w_x, w_dt, b_dt, a_log, w_out):
    xz = x @ w_in.T
    xp, zp = xz[..., :D_FF], xz[..., D_FF:]
    xs = xp * jax.nn.sigmoid(xp)
    dbcd = xs @ w_x.T
    delta_r = dbcd[..., :DT_RANK]
    Bm = dbcd[..., DT_RANK:DT_RANK + D_STATE]
    Cm = dbcd[..., DT_RANK + D_STATE:DT_RANK + 2 * D_STATE]
    delta = jax.nn.softplus(delta_r @ w_dt.T + b_dt)
    A = -jnp.exp(a_log)                                      # (1, d_state)
    deltaA = jnp.exp(delta[..., None] * A)                   # (B, L, d_ff, d_state)
    BX = (delta[..., None] * Bm[:, :, None, :]) * xs[..., None]

    def step(h, inp):
        dA_t, bx_t = inp
        h = dA_t * h + bx_t
        return h, h

    def scan_one(dA_b, bx_b):
        h0 = jnp.zeros((D_FF, D_STATE), jnp.float32)
        _, hs = lax.scan(step, h0, (dA_b, bx_b))
        return hs

    hs = jax.vmap(scan_one)(deltaA, BX)                      # (B, L, d_ff, d_state)
    y = jnp.einsum('blfs,bls->blf', hs, Cm)
    zs = zp * jax.nn.sigmoid(zp)
    return (y * zs) @ w_out.T


# --------------------------------------------------------------------------
# Deterministic parameter init (raw torch-layout shapes from __init__)
# --------------------------------------------------------------------------
def init_params(key):
    k1, k2, k3, k4, k5 = jax.random.split(key, 5)
    kin = 1.0 / math.sqrt(D_MODEL)
    kff = 1.0 / math.sqrt(D_FF)
    dt_init_std = DT_RANK ** -0.5 * DT_SCALE

    w_in = jax.random.uniform(k1, (2 * D_FF, D_MODEL), jnp.float32, -kin, kin)
    w_x = jax.random.uniform(k2, (DT_RANK + 2 * D_STATE + D_FF, D_FF),
                             jnp.float32, -kff, kff)
    w_dt = jax.random.uniform(k3, (D_FF, DT_RANK), jnp.float32,
                              -dt_init_std, dt_init_std)          # dt_init='random'
    dt = jnp.clip(
        jnp.exp(jax.random.uniform(k4, (D_FF,), jnp.float32)
                * (math.log(DT_MAX) - math.log(DT_MIN)) + math.log(DT_MIN)),
        DT_INIT_FLOOR)
    b_dt = dt + jnp.log(-jnp.expm1(-dt))                          # inv_dt
    a_log = jnp.log(jnp.arange(1, D_STATE + 1, dtype=jnp.float32))[None, :]
    w_out = jax.random.uniform(k5, (D_MODEL, D_FF), jnp.float32, -kff, kff)
    return (w_in, w_x, w_dt, b_dt, a_log, w_out)


if __name__ == "__main__":
    key = jax.random.PRNGKey(0)
    pkey, xkey = jax.random.split(key)
    raw_params = init_params(pkey)
    x = jax.random.normal(xkey, (BATCH, SEQ_LEN, D_MODEL), jnp.float32)

    kparams = prepare_kernel_params(*raw_params)
    out = jax.block_until_ready(mamba_block(x, *kparams))

    ref = jax.block_until_ready(mamba_ref(x, *raw_params))
    assert out.shape == (BATCH, SEQ_LEN, D_MODEL)
    assert jnp.allclose(out, ref, rtol=1e-2, atol=1e-3), (
        f"max abs err {jnp.max(jnp.abs(out - ref))}")

    print("KERNEL_OK")
</pallas_src>

<mosaic_0001>
module attributes {stable_mosaic.version = 11 : i64} {
  func.func @mamba_block_kernel(%arg0: i32, %arg1: memref<1x8x32xf32, #tpu.memory_space<vmem>>, %arg2: memref<32x64xf32, #tpu.memory_space<vmem>>, %arg3: memref<32x64xf32, #tpu.memory_space<vmem>>, %arg4: memref<64x64xf32, #tpu.memory_space<vmem>>, %arg5: memref<1x64xf32, #tpu.memory_space<vmem>>, %arg6: memref<64x16xf32, #tpu.memory_space<vmem>>, %arg7: memref<64x16xf32, #tpu.memory_space<vmem>>, %arg8: memref<1x16xf32, #tpu.memory_space<vmem>>, %arg9: memref<64x32xf32, #tpu.memory_space<vmem>>, %arg10: memref<1x8x32xf32, #tpu.memory_space<vmem>>, %arg11: memref<8x64xf32, #tpu.memory_space<vmem>>) attributes {dimension_semantics = [#tpu.dimension_semantics<parallel>], iteration_bounds = array<i64: 2>, scalar_prefetch = 0 : i64, scratch_operands = 1 : i64, tpu.core_type = #tpu.core_type<tc>, window_params = [{transform_indices = @transform_0, window_bounds = array<i64: 1, 8, 32>}, {pipeline_mode = #tpu.pipeline_mode<synchronous>, transform_indices = @transform_1, window_bounds = array<i64: 32, 64>}, {pipeline_mode = #tpu.pipeline_mode<synchronous>, transform_indices = @transform_2, window_bounds = array<i64: 32, 64>}, {pipeline_mode = #tpu.pipeline_mode<synchronous>, transform_indices = @transform_3, window_bounds = array<i64: 64, 64>}, {pipeline_mode = #tpu.pipeline_mode<synchronous>, transform_indices = @transform_4, window_bounds = array<i64: 1, 64>}, {pipeline_mode = #tpu.pipeline_mode<synchronous>, transform_indices = @transform_5, window_bounds = array<i64: 64, 16>}, {pipeline_mode = #tpu.pipeline_mode<synchronous>, transform_indices = @transform_6, window_bounds = array<i64: 64, 16>}, {pipeline_mode = #tpu.pipeline_mode<synchronous>, transform_indices = @transform_7, window_bounds = array<i64: 1, 16>}, {pipeline_mode = #tpu.pipeline_mode<synchronous>, transform_indices = @transform_8, window_bounds = array<i64: 64, 32>}, {transform_indices = @transform_9, window_bounds = array<i64: 1, 8, 32>}]} {
    %c0 = arith.constant 0 : index
    %c0_0 = arith.constant 0 : index
    %c0_1 = arith.constant 0 : index
    %0 = vector.load %arg1[%c0, %c0_0, %c0_1] : memref<1x8x32xf32, #tpu.memory_space<vmem>>, vector<1x8x32xf32>
    %1 = vector.shape_cast %0 : vector<1x8x32xf32> to vector<8x32xf32>
    %c0_2 = arith.constant 0 : index
    %c0_3 = arith.constant 0 : index
    %2 = vector.load %arg2[%c0_2, %c0_3] : memref<32x64xf32, #tpu.memory_space<vmem>>, vector<32x64xf32>
    %cst = arith.constant dense<0.000000e+00> : vector<8x64xf32>
    %3 = tpu.matmul %1, %2, %cst {dimension_numbers = #tpu.dot_dimension_numbers<[1], [0], [0], [1], [0, 0, 1, 1], [], []>} : vector<8x32xf32>, vector<32x64xf32>, vector<8x64xf32> -> vector<8x64xf32>
    %c0_4 = arith.constant 0 : index
    %c0_5 = arith.constant 0 : index
    %4 = vector.load %arg3[%c0_4, %c0_5] : memref<32x64xf32, #tpu.memory_space<vmem>>, vector<32x64xf32>
    %cst_6 = arith.constant dense<0.000000e+00> : vector<8x64xf32>
    %5 = tpu.matmul %1, %4, %cst_6 {dimension_numbers = #tpu.dot_dimension_numbers<[1], [0], [0], [1], [0, 0, 1, 1], [], []>} : vector<8x32xf32>, vector<32x64xf32>, vector<8x64xf32> -> vector<8x64xf32>
    %6 = arith.negf %3 : vector<8x64xf32>
    %7 = math.exp %6 : vector<8x64xf32>
    %cst_7 = arith.constant 1.000000e+00 : f32
    %8 = vector.broadcast %cst_7 : f32 to vector<8x64xf32>
    %9 = arith.addf %8, %7 : vector<8x64xf32>
    %10 = arith.divf %8, %9 : vector<8x64xf32>
    %11 = arith.mulf %3, %10 : vector<8x64xf32>
    %c0_8 = arith.constant 0 : index
    %c0_9 = arith.constant 0 : index
    %12 = vector.load %arg4[%c0_8, %c0_9] : memref<64x64xf32, #tpu.memory_space<vmem>>, vector<64x64xf32>
    %cst_10 = arith.constant dense<0.000000e+00> : vector<8x64xf32>
    %13 = tpu.matmul %11, %12, %cst_10 {dimension_numbers = #tpu.dot_dimension_numbers<[1], [0], [0], [1], [0, 0, 1, 1], [], []>} : vector<8x64xf32>, vector<64x64xf32>, vector<8x64xf32> -> vector<8x64xf32>
    %c0_11 = arith.constant 0 : index
    %c0_12 = arith.constant 0 : index
    %14 = vector.load %arg5[%c0_11, %c0_12] : memref<1x64xf32, #tpu.memory_space<vmem>>, vector<1x64xf32>
    %15 = vector.broadcast %14 : vector<1x64xf32> to vector<8x64xf32>
    %16 = arith.addf %13, %15 : vector<8x64xf32>
    %cst_13 = arith.constant 0.000000e+00 : f32
    %17 = vector.broadcast %cst_13 : f32 to vector<8x64xf32>
    %18 = arith.maximumf %16, %17 : vector<8x64xf32>
    %19 = vector.broadcast %cst_13 : f32 to vector<8x64xf32>
    %20 = arith.subf %16, %19 : vector<8x64xf32>
    %21 = arith.cmpf one, %20, %20 : vector<8x64xf32>
    %22 = vector.broadcast %cst_13 : f32 to vector<8x64xf32>
    %23 = arith.addf %16, %22 : vector<8x64xf32>
    %24 = math.absf %20 : vector<8x64xf32>
    %cst_14 = arith.constant 0.000000e+00 : f32
    %25 = vector.broadcast %cst_14 : f32 to vector<8x64xf32>
    %26 = arith.subf %25, %24 : vector<8x64xf32>
    %27 = math.exp %26 : vector<8x64xf32>
    %28 = math.log1p %27 : vector<8x64xf32>
    %29 = arith.addf %18, %28 : vector<8x64xf32>
    %30 = arith.select %21, %23, %29 : vector<8x64xi1>, vector<8x64xf32>
    %c0_15 = arith.constant 0 : index
    %c0_16 = arith.constant 0 : index
    %31 = vector.load %arg6[%c0_15, %c0_16] : memref<64x16xf32, #tpu.memory_space<vmem>>, vector<64x16xf32>
    %cst_17 = arith.constant dense<0.000000e+00> : vector<8x16xf32>
    %32 = tpu.matmul %11, %31, %cst_17 {dimension_numbers = #tpu.dot_dimension_numbers<[1], [0], [0], [1], [0, 0, 1, 1], [], []>} : vector<8x64xf32>, vector<64x16xf32>, vector<8x16xf32> -> vector<8x16xf32>
    %c0_18 = arith.constant 0 : index
    %c0_19 = arith.constant 0 : index
    %33 = vector.load %arg7[%c0_18, %c0_19] : memref<64x16xf32, #tpu.memory_space<vmem>>, vector<64x16xf32>
    %cst_20 = arith.constant dense<0.000000e+00> : vector<8x16xf32>
    %34 = tpu.matmul %11, %33, %cst_20 {dimension_numbers = #tpu.dot_dimension_numbers<[1], [0], [0], [1], [0, 0, 1, 1], [], []>} : vector<8x64xf32>, vector<64x16xf32>, vector<8x16xf32> -> vector<8x16xf32>
    %c0_21 = arith.constant 0 : index
    %c0_22 = arith.constant 0 : index
    %35 = vector.load %arg8[%c0_21, %c0_22] : memref<1x16xf32, #tpu.memory_space<vmem>>, vector<1x16xf32>
    %36 = math.exp %35 : vector<1x16xf32>
    %37 = tpu.transpose %36, [1, 0] : vector<1x16xf32> -> vector<16x1xf32>
    %cst_23 = arith.constant 0.000000e+00 : f32
    %38 = vector.broadcast %cst_23 : f32 to vector<16x1xf32>
    %39 = arith.subf %38, %37 : vector<16x1xf32>
    %40 = arith.mulf %30, %11 : vector<8x64xf32>
    %41 = tpu.transpose %32, [1, 0] : vector<8x16xf32> -> vector<16x8xf32>
    %42 = tpu.transpose %34, [1, 0] : vector<8x16xf32> -> vector<16x8xf32>
    %cst_24 = arith.constant 0.000000e+00 : f32
    %43 = vector.broadcast %cst_24 : f32 to vector<16x64xf32>
    %44 = vector.extract_strided_slice %30 {offsets = [0, 0], sizes = [1, 64], strides = [1, 1]} : vector<8x64xf32> to vector<1x64xf32>
    %45 = vector.broadcast %39 : vector<16x1xf32> to vector<16x64xf32>
    %46 = vector.broadcast %44 : vector<1x64xf32> to vector<16x64xf32>
    %47 = arith.mulf %45, %46 : vector<16x64xf32>
    %48 = math.exp %47 : vector<16x64xf32>
    %49 = vector.extract_strided_slice %41 {offsets = [0, 0], sizes = [16, 1], strides = [1, 1]} : vector<16x8xf32> to vector<16x1xf32>
    %50 = vector.extract_strided_slice %40 {offsets = [0, 0], sizes = [1, 64], strides = [1, 1]} : vector<8x64xf32> to vector<1x64xf32>
    %51 = vector.broadcast %49 : vector<16x1xf32> to vector<16x64xf32>
    %52 = vector.broadcast %50 : vector<1x64xf32> to vector<16x64xf32>
    %53 = arith.mulf %51, %52 : vector<16x64xf32>
    %54 = arith.mulf %48, %43 : vector<16x64xf32>
    %55 = arith.addf %54, %53 : vector<16x64xf32>
    %56 = vector.extract_strided_slice %42 {offsets = [0, 0], sizes = [16, 1], strides = [1, 1]} : vector<16x8xf32> to vector<16x1xf32>
    %57 = vector.broadcast %56 : vector<16x1xf32> to vector<16x64xf32>
    %58 = arith.mulf %55, %57 : vector<16x64xf32>
    %cst_25 = arith.constant dense<0.000000e+00> : vector<64xf32>
    %59 = vector.multi_reduction <add>, %58, %cst_25 [0] : vector<16x64xf32> to vector<64xf32>
    %60 = vector.shape_cast %59 : vector<64xf32> to vector<1x64xf32>
    %c0_26 = arith.constant 0 : index
    %c0_27 = arith.constant 0 : index
    %61 = vector.load %arg11[%c0_26, %c0_27] : memref<8x64xf32, #tpu.memory_space<vmem>>, vector<1x64xf32>
    tpu.vector_store %arg11[%c0_26, %c0_27], %60 {strides = array<i32>} : memref<8x64xf32, #tpu.memory_space<vmem>>, vector<1x64xf32>,
    %62 = vector.extract_strided_slice %30 {offsets = [1, 0], sizes = [1, 64], strides = [1, 1]} : vector<8x64xf32> to vector<1x64xf32>
    %63 = vector.broadcast %39 : vector<16x1xf32> to vector<16x64xf32>
    %64 = vector.broadcast %62 : vector<1x64xf32> to vector<16x64xf32>
    %65 = arith.mulf %63, %64 : vector<16x64xf32>
    %66 = math.exp %65 : vector<16x64xf32>
    %67 = vector.extract_strided_slice %41 {offsets = [0, 1], sizes = [16, 1], strides = [1, 1]} : vector<16x8xf32> to vector<16x1xf32>
    %68 = vector.extract_strided_slice %40 {offsets = [1, 0], sizes = [1, 64], strides = [1, 1]} : vector<8x64xf32> to vector<1x64xf32>
    %69 = vector.broadcast %67 : vector<16x1xf32> to vector<16x64xf32>
    %70 = vector.broadcast %68 : vector<1x64xf32> to vector<16x64xf32>
    %71 = arith.mulf %69, %70 : vector<16x64xf32>
    %72 = arith.mulf %66, %55 : vector<16x64xf32>
    %73 = arith.addf %72, %71 : vector<16x64xf32>
    %74 = vector.extract_strided_slice %42 {offsets = [0, 1], sizes = [16, 1], strides = [1, 1]} : vector<16x8xf32> to vector<16x1xf32>
    %75 = vector.broadcast %74 : vector<16x1xf32> to vector<16x64xf32>
    %76 = arith.mulf %73, %75 : vector<16x64xf32>
    %cst_28 = arith.constant dense<0.000000e+00> : vector<64xf32>
    %77 = vector.multi_reduction <add>, %76, %cst_28 [0] : vector<16x64xf32> to vector<64xf32>
    %78 = vector.shape_cast %77 : vector<64xf32> to vector<1x64xf32>
    %c1 = arith.constant 1 : index
    %c0_29 = arith.constant 0 : index
    %79 = vector.load %arg11[%c1, %c0_29] : memref<8x64xf32, #tpu.memory_space<vmem>>, vector<1x64xf32>
    tpu.vector_store %arg11[%c1, %c0_29], %78 {strides = array<i32>} : memref<8x64xf32, #tpu.memory_space<vmem>>, vector<1x64xf32>,
    %80 = vector.extract_strided_slice %30 {offsets = [2, 0], sizes = [1, 64], strides = [1, 1]} : vector<8x64xf32> to vector<1x64xf32>
    %81 = vector.broadcast %39 : vector<16x1xf32> to vector<16x64xf32>
    %82 = vector.broadcast %80 : vector<1x64xf32> to vector<16x64xf32>
    %83 = arith.mulf %81, %82 : vector<16x64xf32>
    %84 = math.exp %83 : vector<16x64xf32>
    %85 = vector.extract_strided_slice %41 {offsets = [0, 2], sizes = [16, 1], strides = [1, 1]} : vector<16x8xf32> to vector<16x1xf32>
    %86 = vector.extract_strided_slice %40 {offsets = [2, 0], sizes = [1, 64], strides = [1, 1]} : vector<8x64xf32> to vector<1x64xf32>
    %87 = vector.broadcast %85 : vector<16x1xf32> to vector<16x64xf32>
    %88 = vector.broadcast %86 : vector<1x64xf32> to vector<16x64xf32>
    %89 = arith.mulf %87, %88 : vector<16x64xf32>
    %90 = arith.mulf %84, %73 : vector<16x64xf32>
    %91 = arith.addf %90, %89 : vector<16x64xf32>
    %92 = vector.extract_strided_slice %42 {offsets = [0, 2], sizes = [16, 1], strides = [1, 1]} : vector<16x8xf32> to vector<16x1xf32>
    %93 = vector.broadcast %92 : vector<16x1xf32> to vector<16x64xf32>
    %94 = arith.mulf %91, %93 : vector<16x64xf32>
    %cst_30 = arith.constant dense<0.000000e+00> : vector<64xf32>
    %95 = vector.multi_reduction <add>, %94, %cst_30 [0] : vector<16x64xf32> to vector<64xf32>
    %96 = vector.shape_cast %95 : vector<64xf32> to vector<1x64xf32>
    %c2 = arith.constant 2 : index
    %c0_31 = arith.constant 0 : index
    %97 = vector.load %arg11[%c2, %c0_31] : memref<8x64xf32, #tpu.memory_space<vmem>>, vector<1x64xf32>
    tpu.vector_store %arg11[%c2, %c0_31], %96 {strides = array<i32>} : memref<8x64xf32, #tpu.memory_space<vmem>>, vector<1x64xf32>,
    %98 = vector.extract_strided_slice %30 {offsets = [3, 0], sizes = [1, 64], strides = [1, 1]} : vector<8x64xf32> to vector<1x64xf32>
    %99 = vector.broadcast %39 : vector<16x1xf32> to vector<16x64xf32>
    %100 = vector.broadcast %98 : vector<1x64xf32> to vector<16x64xf32>
    %101 = arith.mulf %99, %100 : vector<16x64xf32>
    %102 = math.exp %101 : vector<16x64xf32>
    %103 = vector.extract_strided_slice %41 {offsets = [0, 3], sizes = [16, 1], strides = [1, 1]} : vector<16x8xf32> to vector<16x1xf32>
    %104 = vector.extract_strided_slice %40 {offsets = [3, 0], sizes = [1, 64], strides = [1, 1]} : vector<8x64xf32> to vector<1x64xf32>
    %105 = vector.broadcast %103 : vector<16x1xf32> to vector<16x64xf32>
    %106 = vector.broadcast %104 : vector<1x64xf32> to vector<16x64xf32>
    %107 = arith.mulf %105, %106 : vector<16x64xf32>
    %108 = arith.mulf %102, %91 : vector<16x64xf32>
    %109 = arith.addf %108, %107 : vector<16x64xf32>
    %110 = vector.extract_strided_slice %42 {offsets = [0, 3], sizes = [16, 1], strides = [1, 1]} : vector<16x8xf32> to vector<16x1xf32>
    %111 = vector.broadcast %110 : vector<16x1xf32> to vector<16x64xf32>
    %112 = arith.mulf %109, %111 : vector<16x64xf32>
    %cst_32 = arith.constant dense<0.000000e+00> : vector<64xf32>
    %113 = vector.multi_reduction <add>, %112, %cst_32 [0] : vector<16x64xf32> to vector<64xf32>
    %114 = vector.shape_cast %113 : vector<64xf32> to vector<1x64xf32>
    %c3 = arith.constant 3 : index
    %c0_33 = arith.constant 0 : index
    %115 = vector.load %arg11[%c3, %c0_33] : memref<8x64xf32, #tpu.memory_space<vmem>>, vector<1x64xf32>
    tpu.vector_store %arg11[%c3, %c0_33], %114 {strides = array<i32>} : memref<8x64xf32, #tpu.memory_space<vmem>>, vector<1x64xf32>,
    %116 = vector.extract_strided_slice %30 {offsets = [4, 0], sizes = [1, 64], strides = [1, 1]} : vector<8x64xf32> to vector<1x64xf32>
    %117 = vector.broadcast %39 : vector<16x1xf32> to vector<16x64xf32>
    %118 = vector.broadcast %116 : vector<1x64xf32> to vector<16x64xf32>
    %119 = arith.mulf %117, %118 : vector<16x64xf32>
    %120 = math.exp %119 : vector<16x64xf32>
    %121 = vector.extract_strided_slice %41 {offsets = [0, 4], sizes = [16, 1], strides = [1, 1]} : vector<16x8xf32> to vector<16x1xf32>
    %122 = vector.extract_strided_slice %40 {offsets = [4, 0], sizes = [1, 64], strides = [1, 1]} : vector<8x64xf32> to vector<1x64xf32>
    %123 = vector.broadcast %121 : vector<16x1xf32> to vector<16x64xf32>
    %124 = vector.broadcast %122 : vector<1x64xf32> to vector<16x64xf32>
    %125 = arith.mulf %123, %124 : vector<16x64xf32>
    %126 = arith.mulf %120, %109 : vector<16x64xf32>
    %127 = arith.addf %126, %125 : vector<16x64xf32>
    %128 = vector.extract_strided_slice %42 {offsets = [0, 4], sizes = [16, 1], strides = [1, 1]} : vector<16x8xf32> to vector<16x1xf32>
    %129 = vector.broadcast %128 : vector<16x1xf32> to vector<16x64xf32>
    %130 = arith.mulf %127, %129 : vector<16x64xf32>
    %cst_34 = arith.constant dense<0.000000e+00> : vector<64xf32>
    %131 = vector.multi_reduction <add>, %130, %cst_34 [0] : vector<16x64xf32> to vector<64xf32>
    %132 = vector.shape_cast %131 : vector<64xf32> to vector<1x64xf32>
    %c4 = arith.constant 4 : index
    %c0_35 = arith.constant 0 : index
    %133 = vector.load %arg11[%c4, %c0_35] : memref<8x64xf32, #tpu.memory_space<vmem>>, vector<1x64xf32>
    tpu.vector_store %arg11[%c4, %c0_35], %132 {strides = array<i32>} : memref<8x64xf32, #tpu.memory_space<vmem>>, vector<1x64xf32>,
    %134 = vector.extract_strided_slice %30 {offsets = [5, 0], sizes = [1, 64], strides = [1, 1]} : vector<8x64xf32> to vector<1x64xf32>
    %135 = vector.broadcast %39 : vector<16x1xf32> to vector<16x64xf32>
    %136 = vector.broadcast %134 : vector<1x64xf32> to vector<16x64xf32>
    %137 = arith.mulf %135, %136 : vector<16x64xf32>
    %138 = math.exp %137 : vector<16x64xf32>
    %139 = vector.extract_strided_slice %41 {offsets = [0, 5], sizes = [16, 1], strides = [1, 1]} : vector<16x8xf32> to vector<16x1xf32>
    %140 = vector.extract_strided_slice %40 {offsets = [5, 0], sizes = [1, 64], strides = [1, 1]} : vector<8x64xf32> to vector<1x64xf32>
    %141 = vector.broadcast %139 : vector<16x1xf32> to vector<16x64xf32>
    %142 = vector.broadcast %140 : vector<1x64xf32> to vector<16x64xf32>
    %143 = arith.mulf %141, %142 : vector<16x64xf32>
    %144 = arith.mulf %138, %127 : vector<16x64xf32>
    %145 = arith.addf %144, %143 : vector<16x64xf32>
    %146 = vector.extract_strided_slice %42 {offsets = [0, 5], sizes = [16, 1], strides = [1, 1]} : vector<16x8xf32> to vector<16x1xf32>
    %147 = vector.broadcast %146 : vector<16x1xf32> to vector<16x64xf32>
    %148 = arith.mulf %145, %147 : vector<16x64xf32>
    %cst_36 = arith.constant dense<0.000000e+00> : vector<64xf32>
    %149 = vector.multi_reduction <add>, %148, %cst_36 [0] : vector<16x64xf32> to vector<64xf32>
    %150 = vector.shape_cast %149 : vector<64xf32> to vector<1x64xf32>
    %c5 = arith.constant 5 : index
    %c0_37 = arith.constant 0 : index
    %151 = vector.load %arg11[%c5, %c0_37] : memref<8x64xf32, #tpu.memory_space<vmem>>, vector<1x64xf32>
    tpu.vector_store %arg11[%c5, %c0_37], %150 {strides = array<i32>} : memref<8x64xf32, #tpu.memory_space<vmem>>, vector<1x64xf32>,
    %152 = vector.extract_strided_slice %30 {offsets = [6, 0], sizes = [1, 64], strides = [1, 1]} : vector<8x64xf32> to vector<1x64xf32>
    %153 = vector.broadcast %39 : vector<16x1xf32> to vector<16x64xf32>
    %154 = vector.broadcast %152 : vector<1x64xf32> to vector<16x64xf32>
    %155 = arith.mulf %153, %154 : vector<16x64xf32>
    %156 = math.exp %155 : vector<16x64xf32>
    %157 = vector.extract_strided_slice %41 {offsets = [0, 6], sizes = [16, 1], strides = [1, 1]} : vector<16x8xf32> to vector<16x1xf32>
    %158 = vector.extract_strided_slice %40 {offsets = [6, 0], sizes = [1, 64], strides = [1, 1]} : vector<8x64xf32> to vector<1x64xf32>
    %159 = vector.broadcast %157 : vector<16x1xf32> to vector<16x64xf32>
    %160 = vector.broadcast %158 : vector<1x64xf32> to vector<16x64xf32>
    %161 = arith.mulf %159, %160 : vector<16x64xf32>
    %162 = arith.mulf %156, %145 : vector<16x64xf32>
    %163 = arith.addf %162, %161 : vector<16x64xf32>
    %164 = vector.extract_strided_slice %42 {offsets = [0, 6], sizes = [16, 1], strides = [1, 1]} : vector<16x8xf32> to vector<16x1xf32>
    %165 = vector.broadcast %164 : vector<16x1xf32> to vector<16x64xf32>
    %166 = arith.mulf %163, %165 : vector<16x64xf32>
    %cst_38 = arith.constant dense<0.000000e+00> : vector<64xf32>
    %167 = vector.multi_reduction <add>, %166, %cst_38 [0] : vector<16x64xf32> to vector<64xf32>
    %168 = vector.shape_cast %167 : vector<64xf32> to vector<1x64xf32>
    %c6 = arith.constant 6 : index
    %c0_39 = arith.constant 0 : index
    %169 = vector.load %arg11[%c6, %c0_39] : memref<8x64xf32, #tpu.memory_space<vmem>>, vector<1x64xf32>
    tpu.vector_store %arg11[%c6, %c0_39], %168 {strides = array<i32>} : memref<8x64xf32, #tpu.memory_space<vmem>>, vector<1x64xf32>,
    %170 = vector.extract_strided_slice %30 {offsets = [7, 0], sizes = [1, 64], strides = [1, 1]} : vector<8x64xf32> to vector<1x64xf32>
    %171 = vector.broadcast %39 : vector<16x1xf32> to vector<16x64xf32>
    %172 = vector.broadcast %170 : vector<1x64xf32> to vector<16x64xf32>
    %173 = arith.mulf %171, %172 : vector<16x64xf32>
    %174 = math.exp %173 : vector<16x64xf32>
    %175 = vector.extract_strided_slice %41 {offsets = [0, 7], sizes = [16, 1], strides = [1, 1]} : vector<16x8xf32> to vector<16x1xf32>
    %176 = vector.extract_strided_slice %40 {offsets = [7, 0], sizes = [1, 64], strides = [1, 1]} : vector<8x64xf32> to vector<1x64xf32>
    %177 = vector.broadcast %175 : vector<16x1xf32> to vector<16x64xf32>
    %178 = vector.broadcast %176 : vector<1x64xf32> to vector<16x64xf32>
    %179 = arith.mulf %177, %178 : vector<16x64xf32>
    %180 = arith.mulf %174, %163 : vector<16x64xf32>
    %181 = arith.addf %180, %179 : vector<16x64xf32>
    %182 = vector.extract_strided_slice %42 {offsets = [0, 7], sizes = [16, 1], strides = [1, 1]} : vector<16x8xf32> to vector<16x1xf32>
    %183 = vector.broadcast %182 : vector<16x1xf32> to vector<16x64xf32>
    %184 = arith.mulf %181, %183 : vector<16x64xf32>
    %cst_40 = arith.constant dense<0.000000e+00> : vector<64xf32>
    %185 = vector.multi_reduction <add>, %184, %cst_40 [0] : vector<16x64xf32> to vector<64xf32>
    %186 = vector.shape_cast %185 : vector<64xf32> to vector<1x64xf32>
    %c7 = arith.constant 7 : index
    %c0_41 = arith.constant 0 : index
    %187 = vector.load %arg11[%c7, %c0_41] : memref<8x64xf32, #tpu.memory_space<vmem>>, vector<1x64xf32>
    tpu.vector_store %arg11[%c7, %c0_41], %186 {strides = array<i32>} : memref<8x64xf32, #tpu.memory_space<vmem>>, vector<1x64xf32>,
    %c0_42 = arith.constant 0 : index
    %c0_43 = arith.constant 0 : index
    %188 = vector.load %arg11[%c0_42, %c0_43] : memref<8x64xf32, #tpu.memory_space<vmem>>, vector<8x64xf32>
    %189 = arith.negf %5 : vector<8x64xf32>
    %190 = math.exp %189 : vector<8x64xf32>
    %cst_44 = arith.constant 1.000000e+00 : f32
    %191 = vector.broadcast %cst_44 : f32 to vector<8x64xf32>
    %192 = arith.addf %191, %190 : vector<8x64xf32>
    %193 = arith.divf %191, %192 : vector<8x64xf32>
    %194 = arith.mulf %5, %193 : vector<8x64xf32>
    %195 = arith.mulf %188, %194 : vector<8x64xf32>
    %c0_45 = arith.constant 0 : index
    %c0_46 = arith.constant 0 : index
    %196 = vector.load %arg9[%c0_45, %c0_46] : memref<64x32xf32, #tpu.memory_space<vmem>>, vector<64x32xf32>
    %cst_47 = arith.constant dense<0.000000e+00> : vector<8x32xf32>
    %197 = tpu.matmul %195, %196, %cst_47 {dimension_numbers = #tpu.dot_dimension_numbers<[1], [0], [0], [1], [0, 0, 1, 1], [], []>} : vector<8x64xf32>, vector<64x32xf32>, vector<8x32xf32> -> vector<8x32xf32>
    %c0_48 = arith.constant 0 : index
    %c0_49 = arith.constant 0 : index
    %c0_50 = arith.constant 0 : index
    %198 = vector.load %arg10[%c0_48, %c0_49, %c0_50] : memref<1x8x32xf32, #tpu.memory_space<vmem>>, vector<1x8x32xf32>
    %199 = vector.shape_cast %198 : vector<1x8x32xf32> to vector<8x32xf32>
    %200 = vector.shape_cast %197 : vector<8x32xf32> to vector<1x8x32xf32>
    tpu.vector_store %arg10[%c0_48, %c0_49, %c0_50], %200 {strides = array<i32>} : memref<1x8x32xf32, #tpu.memory_space<vmem>>, vector<1x8x32xf32>,
    return
  }
  func.func @transform_0(%arg0: i32) -> (i32, i32, i32) {
    %c0_i32 = arith.constant 0 : i32
    %c0_i32_0 = arith.constant 0 : i32
    %c0_i32_1 = arith.constant 0 : i32
    return %arg0, %c0_i32, %c0_i32_0 : i32, i32, i32
  }
  func.func @transform_1(%arg0: i32) -> (i32, i32) {
    %c0_i32 = arith.constant 0 : i32
    %c0_i32_0 = arith.constant 0 : i32
    %c0_i32_1 = arith.constant 0 : i32
    return %c0_i32, %c0_i32_0 : i32, i32
  }
  func.func @transform_2(%arg0: i32) -> (i32, i32) {
    %c0_i32 = arith.constant 0 : i32
    %c0_i32_0 = arith.constant 0 : i32
    %c0_i32_1 = arith.constant 0 : i32
    return %c0_i32, %c0_i32_0 : i32, i32
  }
  func.func @transform_3(%arg0: i32) -> (i32, i32) {
    %c0_i32 = arith.constant 0 : i32
    %c0_i32_0 = arith.constant 0 : i32
    %c0_i32_1 = arith.constant 0 : i32
    return %c0_i32, %c0_i32_0 : i32, i32
  }
  func.func @transform_4(%arg0: i32) -> (i32, i32) {
    %c0_i32 = arith.constant 0 : i32
    %c0_i32_0 = arith.constant 0 : i32
    %c0_i32_1 = arith.constant 0 : i32
    return %c0_i32, %c0_i32_0 : i32, i32
  }
  func.func @transform_5(%arg0: i32) -> (i32, i32) {
    %c0_i32 = arith.constant 0 : i32
    %c0_i32_0 = arith.constant 0 : i32
    %c0_i32_1 = arith.constant 0 : i32
    return %c0_i32, %c0_i32_0 : i32, i32
  }
  func.func @transform_6(%arg0: i32) -> (i32, i32) {
    %c0_i32 = arith.constant 0 : i32
    %c0_i32_0 = arith.constant 0 : i32
    %c0_i32_1 = arith.constant 0 : i32
    return %c0_i32, %c0_i32_0 : i32, i32
  }
  func.func @transform_7(%arg0: i32) -> (i32, i32) {
    %c0_i32 = arith.constant 0 : i32
    %c0_i32_0 = arith.constant 0 : i32
    %c0_i32_1 = arith.constant 0 : i32
    return %c0_i32, %c0_i32_0 : i32, i32
  }
  func.func @transform_8(%arg0: i32) -> (i32, i32) {
    %c0_i32 = arith.constant 0 : i32
    %c0_i32_0 = arith.constant 0 : i32
    %c0_i32_1 = arith.constant 0 : i32
    return %c0_i32, %c0_i32_0 : i32, i32
  }
  func.func @transform_9(%arg0: i32) -> (i32, i32, i32) {
    %c0_i32 = arith.constant 0 : i32
    %c0_i32_0 = arith.constant 0 : i32
    %c0_i32_1 = arith.constant 0 : i32
    return %arg0, %c0_i32, %c0_i32_0 : i32, i32, i32
  }
}

</mosaic_0001>

<bundles_post_ra>
// kernel: tpu_custom_call.1
= control target key start
LH: loop header
LB: loop body
LE: loop exit
PB: predicated region body
PF: predicated region fallthrough
CT: control target
= control target key end

     0   :  { %14 = vsyncpa [#allocation4], 0  ;;  %s2344_s0 = inlined_call_operand.vmem [shape: f32[2,8,32], index: 0, kind: input, shape index: {}]   ;;  %s2345_s1 = inlined_call_operand.vmem [shape: f32[32,64], index: 1, kind: input, shape index: {}]   ;;  %s2346_s2 = inlined_call_operand.vmem [shape: f32[32,64], index: 2, kind: input, shape index: {}]   ;;  %s2347_s3 = inlined_call_operand.vmem [shape: f32[64,64], index: 3, kind: input, shape index: {}]   ;;  %s2348_s4 = inlined_call_operand.vmem [shape: f32[1,64], index: 4, kind: input, shape index: {}]   ;;  %s2349_s5 = inlined_call_operand.vmem [shape: f32[64,16], index: 5, kind: input, shape index: {}]   ;;  %s2350_s6 = inlined_call_operand.vmem [shape: f32[64,16], index: 6, kind: input, shape index: {}]   ;;  %s2351_s7 = inlined_call_operand.vmem [shape: f32[1,16], index: 7, kind: input, shape index: {}]   ;;  %s2352_s8 = inlined_call_operand.vmem [shape: f32[64,32], index: 8, kind: input, shape index: {}]   ;;  %s2353_s9 = inlined_call_operand.hbm [shape: f32[2,8,32], index: 9, kind: output, shape index: {}]  }
   0x1   :  { %16 = vsyncpa [#allocation4 + $0x1], 0  ;;  %s1894_s30 = smov 0   ;;  %s1896_s10 = smov 0  }
   0x2   :  { %s1898_s11 = smov 0   ;;  %s1900_s12 = smov 0  }
   0x3 LB: > { %s1915_s13 = sadd.s32 4294967295, %s1830_s12   ;;  %s1416_s14 = sadd.s32 4294967294, %s1830_s12   ;;  %s1830_s12 = sphi %s1900_s12, %s2359_s12   ;;  %s1826_s11 = sphi %s1898_s11, %s2358_s11   ;;  %s1822_s10 = sphi %s1896_s10, %s2357_s10   ;;  %s1818_s30 = sphi %s1894_s30, %s2356_s30  }
   0x4   : > { %s1919_s15 = sadd.s32 1, %s1830_s12   ;;  %s223_s16 = sadd.s32 1, %s1826_s11 }
   0x5   : > { %s220_s17 = ssub.s32 %s1830_s12, %s1919_s15  ;;  %p233_p0 = scmp.ne.s32.totalorder %s1826_s11, %s1822_s10 }
   0x6   : > { %p221_p1 = scmp.eq.s32.totalorder %s220_s17, 0  ;;  %p234_p2 = scmp.eq.s32.totalorder %s1915_s13, 1 }
   0x7   : > { %p239_p3 = scmp.ne.s32.totalorder %s1822_s10, %s1818_s30  ;;  %p240_p4 = scmp.eq.s32.totalorder %s1416_s14, 1 }
   0x8   : > { %s1930_s18 = scalar_select %p221_p1, %s1826_s11, %s223_s16  }
   0x9   : > { %p1932_p5 = por %p234_p2, %p233_p0  ;;  %p1936_p6 = por %p240_p4, %p239_p3 }
   0xa   : > { %p1419_p7 = scmp.ge.s32.totalorder %s1830_s12, 1  ;;  %p289_p8 = scmp.lt.s32.totalorder %s1830_s12, 3 }
   0xc   : > { %p290_p9 = pnand %p1419_p7, %p289_p8 }
   0xd   : > { %v329_v0 = vld [vmem:[%s2345_s1] sm:$0xff] (!%p290_p9)  ;;  %v330_v1 = vld [vmem:[%s2345_s1 + $0x8] sm:$0xff] (!%p290_p9)  ;;  %v331_v2 = vld [vmem:[%s2345_s1 + $0x10] sm:$0xff] (!%p290_p9)  ;;  %v1832_v3 = vmov (!%p290_p9), 0.0|0.0   ;;  %vm1833_vm0 = vmmov (!%p290_p9), 0   ;;  %v1834_v6 = vmov (!%p290_p9), 0.0  }
   0xe   : > { %293 = sbr.rel (%p290_p9) target bundleno = 1072 (0x430), region = 56  ;;  %1579 = vmatprep.subr.bf16.mxu0 (!%p290_p9), %v1832_v3  ;;  %v1580_v4 = vpack.c.bf16 (!%p290_p9), %v330_v1, %v329_v0  ;;  %v332_v5 = vld [vmem:[%s2345_s1 + $0x18] sm:$0xff] (!%p290_p9)  ;;  %1489 = vmatprep.mubr.msk.f32.mxu0 (!%p290_p9), %vm1833_vm0, %v1834_v6  ;;  %p324_p10 = scmp.lt.s32.totalorder (!%p290_p9), %s1915_s13, 1  ;;  %v407_v7 = vld [vmem:[%s2346_s2] sm:$0xff] (!%p290_p9)  ;;  %v408_v8 = vld [vmem:[%s2346_s2 + $0x8] sm:$0xff] (!%p290_p9)  ;;  %vm333_vm1 = vcmask (!%p290_p9), 261120  }
   0xf   : > { %1585 = vmatprep.subr.bf16.mxu1 (!%p290_p9), %v1832_v3  ;;  %v1586_v9 = vpack.c.bf16 (!%p290_p9), %v408_v8, %v407_v7  ;;  %v409_v10 = vld [vmem:[%s2346_s2 + $0x10] sm:$0xff] (!%p290_p9)  ;;  %v410_v11 = vld [vmem:[%s2346_s2 + $0x18] sm:$0xff] (!%p290_p9)  ;;  %1500 = vmatprep.mubr.msk.f32.mxu1 (!%p290_p9), %vm1833_vm0, %v1834_v6  ;;  %v1583_v12 = vpack.c.bf16 (!%p290_p9), %v332_v5, %v331_v2  ;;  %v751_v15 = vld [vmem:[%s2351_s7] sm:$0x1] (!%p290_p9)  ;;  %v1835_v42 = vmov (!%p290_p9), 0   ;;  %vm503_vm2 = vcmask (!%p290_p9), 523264  }
  0x10   : > { %1581 = vmatpush3.bf16.msra.mxu0 (!%p290_p9), %v1580_v4  ;;  %v1589_v13 = vpack.c.bf16 (!%p290_p9), %v410_v11, %v409_v10  ;;  %v752_v16 = vmul.f32 (!%p290_p9), 1.442695, %v751_v15  ;;  %v488_v17 = vld [vmem:[%s2347_s3] sm:$0xff] (!%p290_p9)  ;;  %v489_v18 = vld [vmem:[%s2347_s3 + $0x8] sm:$0xff] (!%p290_p9)  ;;  %v490_v23 = vld [vmem:[%s2347_s3 + $0x10] sm:$0xff] (!%p290_p9)  ;;  %1689 = vset.pattern.permute.xlu1 (!%p290_p9), %v1835_v42  ;;  %v1836_v11 = vmov (!%p290_p9), 5  }
  0x11   : > { %1582 = vmatprep.subr.bf16.mxu0 (!%p290_p9), %v1832_v3  ;;  %1587 = vmatpush3.bf16.msra.mxu1 (!%p290_p9), %v1586_v9  ;;  %v1592_v19 = vpack.c.bf16 (!%p290_p9), %v489_v18, %v488_v17  ;;  %v595_v20 = vld [vmem:[%s2349_s5] sm:$0xff] (!%p290_p9)  ;;  %v596_v21 = vld [vmem:[%s2349_s5 + $0x8] sm:$0xff] (!%p290_p9)  ;;  %v491_v24 = vld [vmem:[%s2347_s3 + $0x18] sm:$0xff] (!%p290_p9)  ;;  %v1840_v17 = vmov (!%p290_p9), 3   ;;  %v1841_v18 = vmov (!%p290_p9), 4   ;;  %vm914_vm5 = vcmask (!%p290_p9), 516096  }
  0x12   : > { %1588 = vmatprep.subr.bf16.mxu1 (!%p290_p9), %v1832_v3  ;;  %1722 = vpow2.f32 (!%p290_p9), %v752_v16  ;;  %v1604_v22 = vpack.c.bf16 (!%p290_p9), %v596_v21, %v595_v20  ;;  %v1595_v25 = vpack.c.bf16 (!%p290_p9), %v491_v24, %v490_v23  ;;  %v597_v26 = vld [vmem:[%s2349_s5 + $0x10] sm:$0xff] (!%p290_p9)  ;;  %v598_v27 = vld [vmem:[%s2349_s5 + $0x18] sm:$0xff] (!%p290_p9)  ;;  %v492_v30 = vld [vmem:[%s2347_s3 + $0x20] sm:$0xff] (!%p290_p9)  ;;  %v1839_v16 = vmov (!%p290_p9), 2   ;;  %s1432_s28 = sshll.u32 (!%p290_p9), %s1915_s13, 7 }
  0x13   : > { %v1607_v28 = vpack.c.bf16 (!%p290_p9), %v598_v27, %v597_v26  ;;  %v493_v31 = vld [vmem:[%s2347_s3 + $0x28] sm:$0xff] (!%p290_p9)  ;;  %v599_v33 = vld [vmem:[%s2349_s5 + $0x20] sm:$0xff] (!%p290_p9)  ;;  %v494_v36 = vld [vmem:[%s2347_s3 + $0x30] sm:$0xff] (!%p290_p9)  ;;  %v1842_v20 = vmov (!%p290_p9), 7   ;;  %s2301_s21 = scalar_lea.hbm (!%p290_p9), %s2353_s9, %s1432_s28 }
  0x14   : > { %1584 = vmatpush3.bf16.msra.mxu0 (!%p290_p9), %v1583_v12  ;;  %v1598_v32 = vpack.c.bf16 (!%p290_p9), %v493_v31, %v492_v30  ;;  %v600_v34 = vld [vmem:[%s2349_s5 + $0x28] sm:$0xff] (!%p290_p9)  ;;  %v495_v37 = vld [vmem:[%s2347_s3 + $0x38] sm:$0xff] (!%p290_p9)  ;;  %v601_v39 = vld [vmem:[%s2349_s5 + $0x30] sm:$0xff] (!%p290_p9) }
  0x15   : > { %s325_s25 = scalar_select %p324_p10, %s1915_s13, 1  ;;  %1590 = vmatpush3.bf16.msra.mxu1 %v1589_v13  ;;  %1591 = vmatprep.subr.bf16.mxu0 %v1832_v3  ;;  %v1610_v35 = vpack.c.bf16 %v600_v34, %v599_v33  ;;  %v1601_v38 = vpack.c.bf16 %v495_v37, %v494_v36  ;;  %v602_v40 = vld [vmem:[%s2349_s5 + $0x38] sm:$0xff]  ;;  %v673_v53 = vld [vmem:[%s2350_s6] sm:$0xff]  ;;  %v674_v54 = vld [vmem:[%s2350_s6 + $0x8] sm:$0xff]  ;;  %v1837_v13 = vmov 1   ;;  %v863_v37 = vlaneseq }
  0x16   : > { %1603 = vmatprep.subr.bf16.mxu1 %v1832_v3  ;;  %v1613_v41 = vpack.c.bf16 %v602_v40, %v601_v39  ;;  %v1616_v57 = vpack.c.bf16 %v674_v54, %v673_v53  ;;  %v675_v59 = vld [vmem:[%s2350_s6 + $0x10] sm:$0xff]  ;;  %v676_v60 = vld [vmem:[%s2350_s6 + $0x18] sm:$0xff]  ;;  %v677_v62 = vld [vmem:[%s2350_s6 + $0x20] sm:$0xff]  ;;  %s1843_s13 = smov [#allocation3]  }
  0x17   : > { %s1421_s26 = sshll.u32 %s325_s25, 3  ;;  %v1619_v61 = vpack.c.bf16 %v676_v60, %v675_v59  ;;  %v678_v63 = vld [vmem:[%s2350_s6 + $0x28] sm:$0xff]  ;;  %v679_v1 = vld [vmem:[%s2350_s6 + $0x30] sm:$0xff]  ;;  %v680_v2 = vld [vmem:[%s2350_s6 + $0x38] sm:$0xff]  ;;  %s1772_s24 = sshll.u32 %s1843_s13, 4  ;;  %s1773_s24 = int_to_ptr.vmem [resolvable:$false] %s1772_s24 }
  0x18   : > { %s327_s29 = scalar_lea.vmem %s2344_s0, %s1421_s26  ;;  %v1622_v0 = vpack.c.bf16 %v678_v63, %v677_v62  ;;  %v1625_v4 = vpack.c.bf16 %v680_v2, %v679_v1  ;;  %v1425_v23 = vld [vmem:[%s2348_s4] ss:$0 sm:$0xff]  ;;  %v1262_v39 = vld [vmem:[%s2352_s8 + $0x8] sm:$0xff]  ;;  %v1263_v40 = vld [vmem:[%s2352_s8 + $0x10] sm:$0xff]  ;;  %s321_s26 = sand.u32 1, %s1822_s10  }
  0x19   : > { %v328_v14 = vld [vmem:[%s327_s29] sm:$0xff]  ;;  %v1267_v53 = vld [vmem:[%s2352_s8 + $0x30] sm:$0xff]  ;;  %v1268_v54 = vld [vmem:[%s2352_s8 + $0x38] sm:$0xff]  ;;  %s1420_s27 = sshll.u32 %s321_s26, 3  ;;  %s1344_s22 = scalar_lea.sflag [#allocation4], %s321_s26 }
  0x1a   : > { %1490 = vmatmul.mubr.msk.f32.vlgmr.msra.gmra.mrb[0].mxu0 %vm333_vm1, %v328_v14  ;;  %1501 = vmatmul.mubr.msk.f32.vlgmr.msra.gmra.mrb[0].mxu1 %vm333_vm1, %v328_v14  ;;  %v1838_v14 = vmov 6   ;;  %s323_s29 = scalar_lea.vmem [#allocation3], %s1420_s27  ;;  %s1774_s25 = scalar_lea.vmem %s1773_s24, 256 }
  0x1b   : > { %1519 = vmatprep.mubr.msk.f32.mxu0 %vm1833_vm0, %v1834_v6  ;;  %1538 = vmatprep.mubr.msk.f32.mxu1 %vm1833_vm0, %v1834_v6  ;;  %s1357_s14 = sshll.u32 %s323_s29, 4  ;;  %s2303_s14 = int_to_ptr.vmem [resolvable:$true] %s1357_s14 }
  0x1c   : > { %1593 = vmatpush3.bf16.msra.mxu0 %v1592_v19  ;;  %1605 = vmatpush3.bf16.msra.mxu1 %v1604_v22  ;;  %v1723_v29 = vpop.eup %1722  ;;  %s1768_s23 = scalar_lea.vmem %s2303_s14, 128  ;;  %p1775_p0 = scmp.lt.s32.totalorder %s2303_s14, %s1773_s24 }
  0x1d   : > { %1594 = vmatprep.subr.bf16.mxu0 %v1832_v3  ;;  %1606 = vmatprep.subr.bf16.mxu1 %v1832_v3  ;;  %p1769_p11 = scmp.ne.s32.totalorder %s2303_s14, %s1768_s23  ;;  %p1776_p1 = scmp.lt.s32.totalorder %s1774_s25, %s1768_s23 }
  0x1e   : > { %754 = vxpose.xlu0.b32.start.end [1/1] (short) (narrow) %v1723_v29, 16 }
  0x1f   : > { %p1770_p12 = pnand %p1769_p11, %p1932_p5  ;;  %p1777_p2 = por %p1776_p1, %p1775_p0 }
  0x20   : > { %1596 = vmatpush3.bf16.msra.mxu0 %v1595_v25  ;;  %1608 = vmatpush3.bf16.msra.mxu1 %v1607_v28 }
  0x21   : > { %1597 = vmatprep.subr.bf16.mxu0 %v1832_v3  ;;  %1609 = vmatprep.subr.bf16.mxu1 %v1832_v3  ;;  %p1771_p13 = pneg %p1770_p12 }
  0x23   : > { %p1778_p3 = pnand %p1777_p2, %p1771_p13 }
  0x24   : > { %1599 = vmatpush3.bf16.msra.mxu0 %v1598_v32  ;;  %1611 = vmatpush3.bf16.msra.mxu1 %v1610_v35 }
  0x25   : > { %1600 = vmatprep.subr.bf16.mxu0 %v1832_v3  ;;  %1612 = vmatprep.subr.bf16.mxu1 %v1832_v3 }
  0x28   : > { %1602 = vmatpush3.bf16.msra.mxu0 %v1601_v38  ;;  %1614 = vmatpush3.bf16.msra.mxu1 %v1613_v41  ;;  %v1261_v38 = vld [vmem:[%s2352_s8] sm:$0xff] }
  0x29   : > { %1615 = vmatprep.subr.bf16.mxu0 %v1832_v3  ;;  %1627 = vmatprep.subr.bf16.mxu1 %v1832_v3  ;;  %v1628_v41 = vpack.c.bf16 %v1262_v39, %v1261_v38 }
  0x9e   : > { %v770_v50 = vpop.trf.xlu0 }
  0x9f   : > { %v786_v51 = vsub.f32 0.0, %v770_v50 }
  0xa1   : > { %855 = vperm.xlu1 %1689, %v786_v51  }
  0xa2   : > { %v771_v52 = vpop.trf.xlu0 }
  0xa3   : > { %v787_v55 = vsub.f32 0.0, %v771_v52 }
  0xa5   : > { %860 = vperm.xlu1 %1689, %v787_v55  }
  0xed   : > { %v403_v43 = vpop.f32.mrb[0].mxu0  ;;  %v2047_v46 = vpop.f32.mrb[0].mxu1 }
  0xee   : > { %v1424_v44 = vmul.f32 -1.442695, %v403_v43  ;;  %v1491_v45 = vpop.f32.mrb[1].mxu0  ;;  %v1502_v47 = vpop.f32.mrb[1].mxu1 }
  0xef   : > { %v2118_v47 = vshrl.u32 %v863_v37, 7 }
  0xf0   : > { %1724 = vpow2.f32 %v1424_v44 }
  0xf1   : > { %v865_v52 = vsub.s32 0, %v2118_v47  ;;  %v918_v60 = vsub.s32 1, %v2118_v47 }
  0xfa   : > { %v1725_v48 = vpop.eup %1724 }
  0xfb   : > { %v484_v49 = vadd.f32 1.0, %v1725_v48  ;;  %v1265_v48 = vld [vmem:[%s2352_s8 + $0x20] sm:$0xff] }
  0xfd   : > { %1726 = vrcp.f32 %v484_v49  ;;  %v1266_v49 = vld [vmem:[%s2352_s8 + $0x28] sm:$0xff] }
  0xfe   : > { %v1634_v51 = vpack.c.bf16 %v1266_v49, %v1265_v48 }
 0x107   : > { %v1727_v56 = vpop.eup %1726 }
 0x108   : > { %v2055_v58 = vmul.f32 %v1727_v56, %v403_v43  ;;  %v1637_v56 = vpack.c.bf16 %v1268_v54, %v1267_v53 }
 0x10a   : > { %1520 = vmatmul.mubr.msk.f32.vlgmr.msra.gmra.mrb[2].mxu0 %vm503_vm2, %v2055_v58  ;;  %1539 = vmatmul.mubr.msk.f32.vlgmr.msra.gmra.mrb[2].mxu1 %vm503_vm2, %v2055_v58 }
 0x10b   : > { %1617 = vmatpush3.bf16.msra.mxu0 %v1616_v57  ;;  %1557 = vmatprep.mubr.msk.f32.mxu0 %vm1833_vm0, %v1834_v6 }
 0x10c   : > { %1618 = vmatprep.subr.bf16.mxu0 %v1832_v3  ;;  %1576 = vmatprep.mubr.msk.f32.mxu1 %vm1833_vm0, %v1834_v6 }
 0x10d   : > { %1629 = vmatpush3.bf16.msra.mxu1 %v1628_v41  ;;  %v1110_v41 = vsub.s32 5, %v2118_v47 }
 0x10e   : > { %1630 = vmatprep.subr.bf16.mxu1 %v1832_v3 }
 0x10f   : > { %1620 = vmatpush3.bf16.msra.mxu0 %v1619_v61 }
 0x110   : > { %1621 = vmatprep.subr.bf16.mxu0 %v1832_v3 }
 0x113   : > { %1623 = vmatpush3.bf16.msra.mxu0 %v1622_v0  ;;  %v966_v0 = vsub.s32 2, %v2118_v47 }
 0x114   : > { %1624 = vmatprep.subr.bf16.mxu0 %v1832_v3 }
 0x117   : > { %1626 = vmatpush3.bf16.msra.mxu0 %v1625_v4 }
 0x11a   : > { %1558 = vmatmul.mubr.msk.f32.vlgmr.msra.gmra.mrb[4].mxu0 %vm503_vm2, %v2055_v58 }
 0x120   : > { %v2093_v19 = vpop.permute.xlu1 %855 }
 0x124   : > { %v2095_v21 = vpop.permute.xlu1 %860 }
 0x1dd   : > { %v2088_v5 = vpop.f32.mrb[2].mxu0  ;;  %v669_v6 = vpop.f32.mrb[2].mxu1 }
 0x1de   : > { %789 = vxpose.xlu0.b32.start.end [1/1] (short) (narrow) %v669_v6, 16  ;;  %v1521_v7 = vpop.f32.mrb[3].mxu0  ;;  %v1540_v8 = vpop.f32.mrb[3].mxu1  ;;  %v574_v25 = vadd.f32 %v1425_v23, %v2088_v5 }
 0x1e0   : > { %v580_v26 = vand.u32 2147483647, %v574_v25  ;;  %v577_v44 = vmax.f32 %v574_v25, 0.0  ;;  %vm578_vm4 = vcmp.ne.f32.partialorder %v574_v25, %v574_v25 }
 0x1e2   : > { %v581_v27 = vsub.f32 0.0, %v580_v26 }
 0x1e4   : > { %v582_v28 = vmul.f32 1.442695, %v581_v27 }
 0x1e6   : > { %1728 = vpow2.f32 %v582_v28 }
 0x1ed   : > { %v747_v9 = vpop.f32.mrb[4].mxu0 }
 0x1ee   : > { %821 = vxpose.xlu1.b32.start.end [1/1] (short) (narrow) %v747_v9, 16  ;;  %v1559_v10 = vpop.f32.mrb[5].mxu0 }
 0x1ef   : > { %v1014_v10 = vsub.s32 3, %v2118_v47 }
 0x1f0   : > { %v1729_v29 = vpop.eup %1728 }
 0x1f1   : > { %v584_v30 = vadd.f32 1.0, %v1729_v29  ;;  %v587_v31 = vmul.f32 -0.5, %v1729_v29  ;;  %v590_v34 = vand.u32 2147483647, %v1729_v29 }
 0x1f3   : > { %1730 = vlog2.f32 %v584_v30  ;;  %v588_v33 = vadd.f32 1.0, %v587_v31  ;;  %vm591_vm3 = vcmp.lt.f32.partialorder %v590_v34, 0.0004427343 }
 0x1f5   : > { %v589_v36 = vmul.f32 %v1729_v29, %v588_v33 }
 0x1fd   : > { %v1731_v32 = vpop.eup %1730 }
 0x1fe   : > { %v586_v35 = vmul.f32 0.6931472, %v1731_v32 }
 0x200   : > { %v592_v43 = vsel %vm591_vm3, %v589_v36, %v586_v35 }
 0x201   : > { %v593_v50 = vadd.f32 %v592_v43, %v577_v44 }
 0x203   : > { %v2135_v55 = vsel %vm578_vm4, %v574_v25, %v593_v50 }
 0x204   : > { %v866_v57 = vrot.slane %v2135_v55, %v865_v52  ;;  %v919_v62 = vrot.slane %v2135_v55, %v918_v60  ;;  %v967_v5 = vrot.slane %v2135_v55, %v966_v0 }
 0x206   : > { %v867_v59 = vmul.f32 %v866_v57, %v2093_v19  ;;  %v920_v63 = vmul.f32 %v919_v62, %v2093_v19  ;;  %v868_v6 = vmul.f32 %v866_v57, %v2095_v21  ;;  %v968_v9 = vmul.f32 %v967_v5, %v2093_v19 }
 0x207   : > { %1690 = vset.pattern.permute.xlu0 %v1835_v42  ;;  %v969_v30 = vmul.f32 %v967_v5, %v2095_v21 }
 0x208   : > { %v869_v61 = vmul.f32 1.442695, %v867_v59  ;;  %v922_v4 = vmul.f32 1.442695, %v920_v63 }
 0x209   : > { %v972_v35 = vmul.f32 1.442695, %v969_v30 }
 0x20a   : > { %1732 = vpow2.f32 %v869_v61 }
 0x20b   : > { %1734 = vpow2.f32 %v922_v4 }
 0x20c   : > { %1695 = vset.pattern.permute.xlu1 %v1836_v11 }
 0x25e   : > { %v805_v12 = vpop.trf.xlu0 }
 0x25f   : > { %875 = vperm.xlu0 %1690, %v805_v12   ;;  %1119 = vperm.xlu1 %1695, %v805_v12  }
 0x262   : > { %v806_v15 = vpop.trf.xlu0 }
 0x263   : > { %1691 = vset.pattern.permute.xlu0 %v1837_v13  ;;  %1696 = vset.pattern.permute.xlu1 %v1838_v14 }
 0x264   : > { %927 = vperm.xlu0 %1691, %v805_v12   ;;  %1167 = vperm.xlu1 %1696, %v805_v12  }
 0x268   : > { %1692 = vset.pattern.permute.xlu0 %v1839_v16  ;;  %1698 = vset.pattern.permute.xlu1 %v1835_v42 }
 0x269   : > { %975 = vperm.xlu0 %1692, %v805_v12   ;;  %880 = vperm.xlu1 %1698, %v806_v15  }
 0x26d   : > { %1693 = vset.pattern.permute.xlu0 %v1840_v17  ;;  %1701 = vset.pattern.permute.xlu1 %v1840_v17 }
 0x26e   : > { %1023 = vperm.xlu0 %1693, %v805_v12   ;;  %1027 = vperm.xlu1 %1701, %v806_v15   ;;  %v837_v22 = vpop.trf.xlu1 }
 0x272   : > { %1694 = vset.pattern.permute.xlu0 %v1841_v18  ;;  %1702 = vset.pattern.permute.xlu1 %v1841_v18  ;;  %v838_v24 = vpop.trf.xlu1 }
 0x273   : > { %1071 = vperm.xlu0 %1694, %v805_v12   ;;  %1075 = vperm.xlu1 %1702, %v806_v15  }
 0x277   : > { %1697 = vset.pattern.permute.xlu0 %v1842_v20  ;;  %1704 = vset.pattern.permute.xlu1 %v1838_v14 }
 0x278   : > { %1215 = vperm.xlu0 %1697, %v805_v12   ;;  %1171 = vperm.xlu1 %1704, %v806_v15   ;;  %v1733_v12 = vpop.eup %1732 }
 0x279   : > { %v1735_v28 = vpop.eup %1734 }
 0x27c   : > { %1699 = vset.pattern.permute.xlu0 %v1837_v13  ;;  %1705 = vset.pattern.permute.xlu1 %v1842_v20 }
 0x27d   : > { %931 = vperm.xlu0 %1699, %v806_v15   ;;  %1219 = vperm.xlu1 %1705, %v806_v15  }
 0x281   : > { %1700 = vset.pattern.permute.xlu0 %v1839_v16  ;;  %1706 = vset.pattern.permute.xlu1 %v1835_v42 }
 0x282   : > { %979 = vperm.xlu0 %1700, %v806_v15   ;;  %895 = vperm.xlu1 %1706, %v837_v22  }
 0x286   : > { %1703 = vset.pattern.permute.xlu0 %v1836_v11  ;;  %1707 = vset.pattern.permute.xlu1 %v1837_v13 }
 0x287   : > { %1123 = vperm.xlu0 %1703, %v806_v15   ;;  %945 = vperm.xlu1 %1707, %v837_v22  }
 0x28b   : > { %1708 = vset.pattern.permute.xlu0 %v1839_v16  ;;  %1709 = vset.pattern.permute.xlu1 %v1840_v17 }
 0x28c   : > { %993 = vperm.xlu0 %1708, %v837_v22   ;;  %1041 = vperm.xlu1 %1709, %v837_v22  }
 0x290   : > { %1711 = vset.pattern.permute.xlu0 %v1836_v11  ;;  %1710 = vset.pattern.permute.xlu1 %v1841_v18 }
 0x291   : > { %1137 = vperm.xlu0 %1711, %v837_v22   ;;  %1089 = vperm.xlu1 %1710, %v837_v22  }
 0x295   : > { %1713 = vset.pattern.permute.xlu0 %v1835_v42  ;;  %1712 = vset.pattern.permute.xlu1 %v1838_v14  ;;  %v1264_v42 = vld [vmem:[%s2352_s8 + $0x18] sm:$0xff] }
 0x296   : > { %1185 = vperm.xlu1 %1712, %v837_v22   ;;  %900 = vperm.xlu0 %1713, %v838_v24   ;;  %v1631_v45 = vpack.c.bf16 %v1264_v42, %v1263_v40 }
 0x298   : > { %1632 = vmatpush3.bf16.msra.mxu1 %v1631_v45 }
 0x299   : > { %1633 = vmatprep.subr.bf16.mxu1 %v1832_v3 }
 0x29a   : > { %1714 = vset.pattern.permute.xlu1 %v1837_v13  ;;  %1716 = vset.pattern.permute.xlu0 %v1840_v17  ;;  %v871_v13 = vmul.f32 1.442695, %v868_v6 }
 0x29b   : > { %949 = vperm.xlu1 %1714, %v838_v24   ;;  %1045 = vperm.xlu0 %1716, %v838_v24  }
 0x29c   : > { %1635 = vmatpush3.bf16.msra.mxu1 %v1634_v51  ;;  %1736 = vpow2.f32 %v871_v13 }
 0x29d   : > { %1636 = vmatprep.subr.bf16.mxu1 %v1832_v3  ;;  %v2149_v3 = vmul.f32 %v2135_v55, %v2055_v58  ;;  %v1015_v58 = vrot.slane %v2135_v55, %v1014_v10 }
 0x29f   : > { %1715 = vset.pattern.permute.xlu1 %v1839_v16  ;;  %1719 = vset.pattern.permute.xlu0 %v1838_v14  ;;  %v970_v16 = vmul.f32 1.442695, %v968_v9  ;;  %v1016_v23 = vmul.f32 %v1015_v58, %v2093_v19  ;;  %v937_v25 = vrot.slane %v2149_v3, %v918_v60  ;;  %v1017_v39 = vmul.f32 %v1015_v58, %v2095_v21 }
 0x2a0   : > { %997 = vperm.xlu1 %1715, %v838_v24   ;;  %1189 = vperm.xlu0 %1719, %v838_v24   ;;  %v985_v43 = vrot.slane %v2149_v3, %v966_v0  ;;  %v1158_v0 = vsub.s32 6, %v2118_v47  ;;  %v1033_v5 = vrot.slane %v2149_v3, %v1014_v10 }
 0x2a1   : > { %1638 = vmatpush3.bf16.msra.mxu1 %v1637_v56  ;;  %1738 = vpow2.f32 %v970_v16  ;;  %v1018_v33 = vmul.f32 1.442695, %v1016_v23  ;;  %v1111_v56 = vrot.slane %v2135_v55, %v1110_v41 }
 0x2a3   : > { %v1112_v63 = vmul.f32 %v1111_v56, %v2093_v19 }
 0x2a4   : > { %1717 = vset.pattern.permute.xlu1 %v1841_v18  ;;  %1721 = vset.pattern.permute.xlu0 %v1842_v20  ;;  %v889_v18 = vmul.f32 0.0, %v1733_v12 }
 0x2a5   : > { %1093 = vperm.xlu1 %1717, %v838_v24   ;;  %v1114_v16 = vmul.f32 1.442695, %v1112_v63 }
 0x2a6   : > { %v1737_v40 = vpop.eup %1736 }
 0x2a7   : > { %v890_v51 = vmul.f32 0.0, %v1737_v40 }
 0x2a9   : > { %1718 = vset.pattern.permute.xlu1 %v1836_v11  ;;  %v886_v11 = vrot.slane %v2149_v3, %v865_v52  ;;  %v1020_v52 = vmul.f32 1.442695, %v1017_v39 }
 0x2aa   : > { %1141 = vperm.xlu1 %1718, %v838_v24  }
 0x2ab   : > { %v1739_v45 = vpop.eup %1738 }
 0x2ae   : > { %1720 = vset.pattern.permute.xlu1 %v1842_v20  ;;  %v921_v20 = vmul.f32 %v919_v62, %v2095_v21 }
 0x2af   : > { %1233 = vperm.xlu1 %1720, %v837_v22  }
 0x2b0   : > { %v924_v29 = vmul.f32 1.442695, %v921_v20 }
 0x2b2   : > { %1740 = vpow2.f32 %v924_v29 }
 0x2b3   : > { %1237 = vperm.xlu1 %1720, %v838_v24   ;;  %v1062_v24 = vsub.s32 4, %v2118_v47  ;;  %1742 = vpow2.f32 %v1018_v33 }
 0x2b4   : > { %1744 = vpow2.f32 %v972_v35 }
 0x2b5   : > { %v1063_v34 = vrot.slane %v2135_v55, %v1062_v24  ;;  %1746 = vpow2.f32 %v1020_v52  ;;  %v1081_v30 = vrot.slane %v2149_v3, %v1062_v24 }
 0x2b7   : > { %v1064_v42 = vmul.f32 %v1063_v34, %v2093_v19  ;;  %v1065_v48 = vmul.f32 %v1063_v34, %v2095_v21 }
 0x2b9   : > { %v1066_v57 = vmul.f32 1.442695, %v1064_v42  ;;  %v1068_v61 = vmul.f32 1.442695, %v1065_v48 }
 0x2bb   : > { %1748 = vpow2.f32 %v1066_v57 }
 0x2bc   : > { %v1741_v62 = vpop.eup %1740  ;;  %1750 = vpow2.f32 %v1068_v61 }
 0x2bd   : > { %v1743_v9 = vpop.eup %1742  ;;  %1752 = vpow2.f32 %v1114_v16 }
 0x2de   : > { %v876_v1 = vpop.permute.xlu0 %875  ;;  %v2144_v2 = vpop.permute.xlu1 %1119 }
 0x2df   : > { %v887_v14 = vmul.f32 %v886_v11, %v876_v1 }
 0x2e1   : > { %v2159_v22 = vadd.f32 %v889_v18, %v887_v14 }
 0x2e3   : > { %v928_v7 = vpop.permute.xlu0 %927  ;;  %v2152_v8 = vpop.permute.xlu1 %1167  ;;  %v940_v32 = vmul.f32 %v1735_v28, %v2159_v22 }
 0x2e4   : > { %v938_v31 = vmul.f32 %v937_v25, %v928_v7 }
 0x2e6   : > { %v2173_v38 = vadd.f32 %v940_v32, %v938_v31 }
 0x2e8   : > { %v976_v15 = vpop.permute.xlu0 %975  ;;  %v881_v17 = vpop.permute.xlu1 %880  ;;  %v988_v50 = vmul.f32 %v1739_v45, %v2173_v38 }
 0x2e9   : > { %v888_v44 = vmul.f32 %v886_v11, %v881_v17  ;;  %v986_v49 = vmul.f32 %v985_v43, %v976_v15  ;;  %v1113_v11 = vmul.f32 %v1111_v56, %v2095_v21  ;;  %v1745_v15 = vpop.eup %1744  ;;  %v1159_v17 = vrot.slane %v2135_v55, %v1158_v0 }
 0x2ea   : > { %v1747_v29 = vpop.eup %1746  ;;  %v1206_v56 = vsub.s32 7, %v2118_v47 }
 0x2eb   : > { %v2188_v59 = vadd.f32 %v890_v51, %v888_v44  ;;  %v2190_v60 = vadd.f32 %v988_v50, %v986_v49  ;;  %v1116_v23 = vmul.f32 1.442695, %v1113_v11  ;;  %v1749_v31 = vpop.eup %1748  ;;  %v1161_v39 = vmul.f32 %v1159_v17, %v2095_v21 }
 0x2ec   : > { %v1751_v45 = vpop.eup %1750 }
 0x2ed   : > { %v1024_v26 = vpop.permute.xlu0 %1023  ;;  %v2164_v27 = vpop.permute.xlu1 %1027  ;;  %v941_v7 = vmul.f32 %v1741_v62, %v2188_v59  ;;  %v1036_v13 = vmul.f32 %v1743_v9, %v2190_v60  ;;  %1754 = vpow2.f32 %v1116_v23  ;;  %v1164_v49 = vmul.f32 1.442695, %v1161_v39 }
 0x2ee   : > { %v1034_v12 = vmul.f32 %v1033_v5, %v1024_v26  ;;  %v1160_v26 = vmul.f32 %v1159_v17, %v2093_v19  ;;  %v1035_v32 = vmul.f32 %v1033_v5, %v2164_v27  ;;  %v1753_v52 = vpop.eup %1752 }
 0x2f2   : > { %v1072_v36 = vpop.permute.xlu0 %1071  ;;  %v2171_v37 = vpop.permute.xlu1 %1075 }
 0x2f3   : > { %v1082_v40 = vmul.f32 %v1081_v30, %v1072_v36  ;;  %v1083_v27 = vmul.f32 %v1081_v30, %v2171_v37  ;;  %v1129_v36 = vrot.slane %v2149_v3, %v1110_v41  ;;  %v1207_v37 = vrot.slane %v2135_v55, %v1206_v56 }
 0x2f4   : > { %v1177_v55 = vrot.slane %v2149_v3, %v1158_v0 }
 0x2f5   : > { %v1130_v5 = vmul.f32 %v1129_v36, %v2144_v2  ;;  %v1209_v16 = vmul.f32 %v1207_v37, %v2095_v21 }
 0x2f6   : > { %v1178_v21 = vmul.f32 %v1177_v55, %v2152_v8 }
 0x2f7   : > { %v2181_v53 = vpop.permute.xlu0 %1215  ;;  %v2183_v54 = vpop.permute.xlu1 %1171 }
 0x2fc   : > { %v932_v1 = vpop.permute.xlu0 %931  ;;  %v2194_v4 = vpop.permute.xlu1 %1219 }
 0x2fd   : > { %v939_v6 = vmul.f32 %v937_v25, %v932_v1  ;;  %v1038_v25 = vadd.f32 %v1036_v13, %v1034_v12  ;;  %v1755_v1 = vpop.eup %1754 }
 0x2ff   : > { %v2200_v14 = vadd.f32 %v941_v7, %v939_v6  ;;  %v1084_v42 = vmul.f32 %v1749_v31, %v1038_v25 }
 0x301   : > { %v980_v58 = vpop.permute.xlu0 %979  ;;  %v989_v10 = vmul.f32 %v1745_v15, %v2200_v14  ;;  %v896_v18 = vpop.permute.xlu1 %895  ;;  %v2215_v50 = vadd.f32 %v1084_v42, %v1082_v40  ;;  %v1208_v15 = vmul.f32 %v1207_v37, %v2093_v19 }
 0x302   : > { %v987_v20 = vmul.f32 %v985_v43, %v980_v58  ;;  %v1162_v43 = vmul.f32 1.442695, %v1160_v26  ;;  %v903_v9 = vmul.f32 %v896_v18, %v2159_v22 }
 0x303   : > { %v1132_v61 = vmul.f32 %v1753_v52, %v2215_v50  ;;  %v1210_v26 = vmul.f32 1.442695, %v1208_v15 }
 0x304   : > { %v2207_v28 = vadd.f32 %v989_v10, %v987_v20  ;;  %1756 = vpow2.f32 %v1162_v43  ;;  %v905_v22 = vsel %vm503_vm2, %v903_v9, 0.0 }
 0x305   : > { %1758 = vpow2.f32 %v1164_v49  ;;  %v2232_v7 = vadd.f32 %v1132_v61, %v1130_v5 }
 0x306   : > { %v1037_v33 = vmul.f32 %v1747_v29, %v2207_v28  ;;  %v1124_v34 = vpop.permute.xlu0 %1123  ;;  %v946_v35 = vpop.permute.xlu1 %945  ;;  %v1212_v29 = vmul.f32 1.442695, %v1209_v16  ;;  %1760 = vpow2.f32 %v1210_v26 }
 0x307   : > { %v1131_v41 = vmul.f32 %v1129_v36, %v1124_v34  ;;  %v952_v10 = vmul.f32 %v946_v35, %v2173_v38  ;;  %v1179_v38 = vmul.f32 %v1177_v55, %v2183_v54 }
 0x308   : > { %v1039_v44 = vadd.f32 %v1037_v33, %v1035_v32  ;;  %1762 = vpow2.f32 %v1212_v29 }
 0x30a   : > { %v1085_v48 = vmul.f32 %v1751_v45, %v1039_v44 }
 0x30b   : > { %v994_v24 = vpop.permute.xlu0 %993  ;;  %v1042_v51 = vpop.permute.xlu1 %1041 }
 0x30c   : > { %v2219_v57 = vadd.f32 %v1085_v48, %v1083_v27  ;;  %v1048_v18 = vmul.f32 %v1042_v51, %v1038_v25  ;;  %v954_v25 = vsel %vm503_vm2, %v952_v10, 0.0  ;;  %v1000_v35 = vmul.f32 %v994_v24, %v2190_v60 }
 0x30e   : > { %v1133_v6 = vmul.f32 %v1755_v1, %v2219_v57  ;;  %v1757_v13 = vpop.eup %1756  ;;  %v1050_v8 = vsel %vm503_vm2, %v1048_v18, 0.0  ;;  %v1002_v52 = vsel %vm503_vm2, %v1000_v35, 0.0 }
 0x30f   : > { %v1180_v58 = vmul.f32 %v1757_v13, %v2232_v7  ;;  %v1759_v19 = vpop.eup %1758 }
 0x310   : > { %v2225_v62 = vpop.permute.xlu0 %1137  ;;  %v1090_v63 = vpop.permute.xlu1 %1089  ;;  %v2237_v17 = vadd.f32 %v1133_v6, %v1131_v41 }
 0x311   : > { %v2249_v32 = vadd.f32 %v1180_v58, %v1178_v21  ;;  %v1096_v9 = vmul.f32 %v1090_v63, %v2215_v50  ;;  %v1144_v21 = vmul.f32 %v2225_v62, %v2232_v7 }
 0x312   : > { %v1181_v31 = vmul.f32 %v1759_v19, %v2237_v17 }
 0x313   : > { %v1146_v47 = vsel %vm503_vm2, %v1144_v21, 0.0 }
 0x315   : > { %v901_v11 = vpop.permute.xlu0 %900  ;;  %v1186_v12 = vpop.permute.xlu1 %1185 }
 0x316   : > { %v904_v2 = vmul.f32 %v901_v11, %v2188_v59  ;;  %v1192_v40 = vmul.f32 %v1186_v12, %v2249_v32 }
 0x318   : > { %v906_v20 = vsel %vm503_vm2, %v904_v2, 0.0  ;;  %v1194_v61 = vsel %vm503_vm2, %v1192_v40, 0.0 }
 0x319   : > { %v907_v23 = vadd.f32 %v906_v20, %v905_v22  ;;  %v1429_v22 = vmul.f32 -1.442695, %v2047_v46  ;;  %v1098_v20 = vsel %vm503_vm2, %v1096_v9, 0.0 }
 0x31a   : > { %v1046_v59 = vpop.permute.xlu0 %1045  ;;  %v950_v30 = vpop.permute.xlu1 %949 }
 0x31b   : > { %v908_v0 = vrot.slane %v907_v23, 4  ;;  %v1049_v33 = vmul.f32 %v1046_v59, %v1039_v44  ;;  %v953_v34 = vmul.f32 %v950_v30, %v2200_v14  ;;  %v2259_v44 = vadd.f32 %v1181_v31, %v1179_v38  ;;  %v1761_v59 = vpop.eup %1760 }
 0x31c   : > { %v1763_v35 = vpop.eup %1762  ;;  %1764 = vpow2.f32 %v1429_v22  ;;  %v1228_v7 = vmul.f32 %v1761_v59, %v2249_v32 }
 0x31d   : > { %v909_v39 = vadd.f32 %v908_v0, %v907_v23  ;;  %v1051_v42 = vsel %vm503_vm2, %v1049_v33, 0.0  ;;  %v955_v43 = vsel %vm503_vm2, %v953_v34, 0.0 }
 0x31e   : > { %v1052_v45 = vadd.f32 %v1051_v42, %v1050_v8  ;;  %v956_v48 = vadd.f32 %v955_v43, %v954_v25  ;;  %v1229_v43 = vmul.f32 %v1763_v35, %v2259_v44 }
 0x31f   : > { %v910_v14 = vrot.slane %v909_v39, 2  ;;  %v1190_v54 = vpop.permute.xlu0 %1189  ;;  %v998_v49 = vpop.permute.xlu1 %997 }
 0x320   : > { %v1053_v51 = vrot.slane %v1052_v45, 4  ;;  %v957_v27 = vrot.slane %v956_v48, 4  ;;  %v1193_v60 = vmul.f32 %v1190_v54, %v2259_v44  ;;  %v1001_v24 = vmul.f32 %v998_v49, %v2207_v28 }
 0x321   : > { %v911_v36 = vadd.f32 %v910_v14, %v909_v39 }
 0x322   : > { %v1054_v1 = vadd.f32 %v1053_v51, %v1052_v45  ;;  %v958_v5 = vadd.f32 %v957_v27, %v956_v48  ;;  %v1195_v37 = vsel %vm503_vm2, %v1193_v60, 0.0  ;;  %v1003_v6 = vsel %vm503_vm2, %v1001_v24, 0.0 }
 0x323   : > { %v912_v41 = vrot.slane %v911_v36, 1  ;;  %v1196_v11 = vadd.f32 %v1195_v37, %v1194_v61  ;;  %v1004_v12 = vadd.f32 %v1003_v6, %v1002_v52 }
 0x324   : > { %v1055_v13 = vrot.slane %v1054_v1, 2  ;;  %v959_v28 = vrot.slane %v958_v5, 2  ;;  %v1094_v15 = vpop.permute.xlu1 %1093 }
 0x325   : > { %v913_v16 = vadd.f32 %v912_v41, %v911_v36  ;;  %v1197_v2 = vrot.slane %v1196_v11, 4  ;;  %v1005_v55 = vrot.slane %v1004_v12, 4  ;;  %v1097_v58 = vmul.f32 %v1094_v15, %v2219_v57 }
 0x326   : > { %v1056_v10 = vadd.f32 %v1055_v13, %v1054_v1  ;;  %v960_v18 = vadd.f32 %v959_v28, %v958_v5  ;;  %v1225_v57 = vrot.slane %v2149_v3, %v1206_v56 }
 0x327   : > { %915 = vst.msk [vmem:[#allocation2] sm:$0x1] %vm914_vm5, %v913_v16  ;;  %v1198_v50 = vadd.f32 %v1197_v2, %v1196_v11  ;;  %v1006_v63 = vadd.f32 %v1005_v55, %v1004_v12  ;;  %v1099_v19 = vsel %vm503_vm2, %v1097_v58, 0.0 }
 0x328   : > { %v1057_v23 = vrot.slane %v1056_v10, 1  ;;  %v961_v26 = vrot.slane %v960_v18, 1  ;;  %v1100_v29 = vadd.f32 %v1099_v19, %v1098_v20  ;;  %v1226_v39 = vmul.f32 %v1225_v57, %v2181_v53 }
 0x329   : > { %v1199_v30 = vrot.slane %v1198_v50, 2  ;;  %v1007_v31 = vrot.slane %v1006_v63, 2  ;;  %v1142_v0 = vpop.permute.xlu1 %1141  ;;  %v1227_v45 = vmul.f32 %v1225_v57, %v2194_v4  ;;  %v1765_v4 = vpop.eup %1764 }
 0x32a   : > { %v1058_v33 = vadd.f32 %v1057_v23, %v1056_v10  ;;  %v962_v34 = vadd.f32 %v961_v26, %v960_v18  ;;  %v1101_v38 = vrot.slane %v1100_v29, 4  ;;  %v1145_v25 = vmul.f32 %v1142_v0, %v2237_v17 }
 0x32b   : > { %v1200_v8 = vadd.f32 %v1199_v30, %v1198_v50  ;;  %v1008_v62 = vadd.f32 %v1007_v31, %v1006_v63  ;;  %v1230_v49 = vadd.f32 %v1228_v7, %v1226_v39  ;;  %v1231_v24 = vadd.f32 %v1229_v43, %v1227_v45 }
 0x32c   : > { %1059 = vst.msk [vmem:[#allocation2 + $0x3] sm:$0x1] %vm914_vm5, %v1058_v33  ;;  %963 = vst.msk [vmem:[#allocation2 + $0x1] sm:$0x1] %vm914_vm5, %v962_v34  ;;  %v1102_v3 = vadd.f32 %v1101_v38, %v1100_v29  ;;  %v1147_v56 = vsel %vm503_vm2, %v1145_v25, 0.0  ;;  %v1256_v12 = vadd.f32 1.0, %v1765_v4 }
 0x32d   : > { %v1201_v40 = vrot.slane %v1200_v8, 1  ;;  %v1009_v42 = vrot.slane %v1008_v62, 1  ;;  %v1148_v17 = vadd.f32 %v1147_v56, %v1146_v47 }
 0x32e   : > { %v1103_v48 = vrot.slane %v1102_v3, 2  ;;  %v1234_v32 = vpop.permute.xlu1 %1233  ;;  %1766 = vrcp.f32 %v1256_v12 }
 0x32f   : > { %v1202_v14 = vadd.f32 %v1201_v40, %v1200_v8  ;;  %v1010_v53 = vadd.f32 %v1009_v42, %v1008_v62  ;;  %v1149_v54 = vrot.slane %v1148_v17, 4  ;;  %v1240_v60 = vmul.f32 %v1234_v32, %v1230_v49 }
 0x330   : > { %v1104_v51 = vadd.f32 %v1103_v48, %v1102_v3 }
 0x331   : > { %1203 = vst.msk [vmem:[#allocation2 + $0x6] sm:$0x1] %vm914_vm5, %v1202_v14  ;;  %1011 = vst.msk [vmem:[#allocation2 + $0x2] sm:$0x1] %vm914_vm5, %v1010_v53  ;;  %v1150_v27 = vadd.f32 %v1149_v54, %v1148_v17  ;;  %v1242_v37 = vsel %vm503_vm2, %v1240_v60, 0.0 }
 0x332   : > { %v1105_v52 = vrot.slane %v1104_v51, 1  ;;  %v1238_v36 = vpop.permute.xlu1 %1237 }
 0x333   : > { %v1151_v61 = vrot.slane %v1150_v27, 2  ;;  %v1241_v44 = vmul.f32 %v1238_v36, %v1231_v24 }
 0x334   : > { %v1106_v1 = vadd.f32 %v1105_v52, %v1104_v51 }
 0x335   : > { %v1152_v5 = vadd.f32 %v1151_v61, %v1150_v27  ;;  %v1243_v6 = vsel %vm503_vm2, %v1241_v44, 0.0 }
 0x336   : > { %1107 = vst.msk [vmem:[#allocation2 + $0x4] sm:$0x1] %vm914_vm5, %v1106_v1  ;;  %v1244_v9 = vadd.f32 %v1243_v6, %v1242_v37 }
 0x337   : > { %v1153_v41 = vrot.slane %v1152_v5, 1 }
 0x338   : > { %v1245_v11 = vrot.slane %v1244_v9, 4  ;;  %v1767_v58 = vpop.eup %1766 }
 0x339   : > { %v1154_v13 = vadd.f32 %v1153_v41, %v1152_v5  ;;  %v1259_v22 = vmul.f32 %v1767_v58, %v2047_v46 }
 0x33a   : > { %v1246_v28 = vadd.f32 %v1245_v11, %v1244_v9 }
 0x33b   : > { %1155 = vst.msk [vmem:[#allocation2 + $0x5] sm:$0x1] %vm914_vm5, %v1154_v13 }
 0x33c   : > { %v1247_v15 = vrot.slane %v1246_v28, 2 }
 0x33e   : > { %v1248_v16 = vadd.f32 %v1247_v15, %v1246_v28 }
 0x340   : > { %v1249_v2 = vrot.slane %v1248_v16, 1 }
 0x342   : > { %v1250_v55 = vadd.f32 %v1249_v2, %v1248_v16 }
 0x344   : > { %1251 = vst.msk [vmem:[#allocation2 + $0x7] sm:$0x1] %vm914_vm5, %v1250_v55 }
 0x34b   : > { %v1252_v10 = vld [vmem:[#allocation2] sm:$0xff] }
 0x34c   : > { %v1260_v18 = vmul.f32 %v1259_v22, %v1252_v10 }
 0x34e   : > { %1577 = vmatmul.mubr.msk.f32.vlgmr.msra.gmra.mrb[4].mxu1 %vm503_vm2, %v1260_v18 }
 0x421   : > { %v1338_v46 = vpop.f32.mrb[4].mxu1 }
 0x422   : > { %1342 = vst.msk [vmem:[%s323_s29] sm:$0xff] %vm333_vm1, %v1338_v46  ;;  %v1578_v20 = vpop.f32.mrb[5].mxu1 }
 0x423   : > { %1781 = shalt.err (!%p1778_p3)
}
 0x424   : > { %s1782_s26 = scalar_lea.hbm %s2301_s21, 128  ;;  %s1786_s29 = scalar_lea.hbm %s2353_s9, 256 }
 0x425   : > { %p1783_p4 = scmp.ne.s32.totalorder %s2301_s21, %s1782_s26  ;;  %p1787_p9 = scmp.lt.u32.totalorder %s2301_s21, %s2353_s9 }
 0x426   : > { %p1788_p10 = scmp.lt.u32.totalorder %s1786_s29, %s1782_s26  ;;  %p1790_p12 = scmp.lt.u32.totalorder %s1782_s26, %s2301_s21 }
 0x427   : > { %p1784_p7 = pnand %p1783_p4, %p1932_p5 }
 0x428   : > { %p1789_p11 = por %p1788_p10, %p1787_p9 }
 0x429   : > { %p1785_p8 = pneg %p1784_p7 }
 0x42a   : > { %p1791_p13 = por %p1790_p12, %p1789_p11 }
 0x42c   : > { %p1792_p0 = pnand %p1791_p13, %p1785_p8 }
 0x42e   : > { %1795 = shalt.err (!%p1792_p0)
}
 0x42f   : > { %1639 = dma.vmem_to_hbm [thread:$0]  (%p1932_p5), %s2303_s14, 128, %s2301_s21, %s1344_s22  }
 0x430 PF: > { %p1645_p1 = scmp.ge.s32.totalorder %s1830_s12, 2  ;;  %s1369_s23 = sand.u32 1, %s1818_s30  }
 0x431   : > { %s1370_s13 = scalar_lea.sflag [#allocation4], %s1369_s23 }
 0x432   : > { %p1642_p2 = pnand %p1645_p1, %p1936_p6 }
 0x434   : > { %1813 = dma.done.wait (!%p1642_p2), %s1370_s13, 128  }
 0x435   : > { %1815 = vsyncadd (!%p1642_p2), %s1370_s13, 4294967168  ;;  %p19_p3 = scmp.ge.s32.totalorder %s1919_s15, 4   ;;  %s2356_s30 = smov %s1822_s10 }
 0x436   : > { %s2357_s10 = smov %s1826_s11  ;;  %s2358_s11 = smov %s1930_s18 }
 0x437   : > { %s2359_s12 = smov %s1919_s15  ;;  %21 = sbr.rel (!%p19_p3) target bundleno = 3 (0x3), region = 91 }
 0x43e   :  { %1375 = vsyncpa [#allocation4], 1 }
 0x43f   :  { %1377 = vsyncpa [#allocation4 + $0x1], 1 }

</bundles_post_ra>
